<compile_context>
chip_gen: v7x
topology: tpu7x:2x2x1
jax: 0.10.0
libtpu: 0.0.40
codegen_flags: <defaults>
</compile_context>

<pallas_src>
import jax
import jax.numpy as jnp
from jax.experimental import pallas as pl
from jax.experimental.pallas import tpu as pltpu

BN_EPS = 1e-5
_MiB = 1024 * 1024


def surv_kernel(x_ref, wcat_ref, bcat_ref, w1row_ref, b1_ref, out_ref):
    x = x_ref[...]                                               # (TB, H1), f32 or bf16

    # One MXU pass covering BN-folded fc0 and fc2: (TB, H1) @ (H1, H2+1), f32 acc.
    res = jnp.dot(x, wcat_ref[...], preferred_element_type=jnp.float32) + bcat_ref[...]

    h2 = wcat_ref.shape[1] - 1
    a = res[:, h2:h2 + 1]                                        # fc2 output   (TB, 1)
    h = jnp.maximum(res[:, :h2], 0.0)                            # BN-folded fc0 + ReLU

    # fc1 (out_features = 1): VPU multiply + lane reduction.  (For H2 in the
    # several-hundreds range an MXU dot h @ w1 would be preferable; not here.)
    y = jnp.sum(h * w1row_ref[...], axis=-1, keepdims=True) + b1_ref[...]

    # Lane-dense (TB, 2) output slab, written without a concat temp.
    out_ref[:, 0:1] = y
    out_ref[:, 1:2] = a


def _round_up(n, m):
    return ((n + m - 1) // m) * m


def _vmem_budget_bytes():
    """~75% of this chip's physical VMEM, capped at 100 MiB.
    Conservative 48 MiB (v7x-safe) fallback if the TPU info query is unavailable."""
    try:
        cap = int(pltpu.get_tpu_info().vmem_capacity_bytes)
    except Exception:
        cap = 64 * _MiB
    return min((cap * 3) // 4, 100 * _MiB)


def _choose_tile_b(B, H1, H2, x_elem_bytes, budget):
    # Grid-invariant (single-buffered) operands + misc slack.
    fixed = (H1 * (H2 + 1) * x_elem_bytes        # wcat
             + (H2 + 1) * 4 + H2 * 4 + 4         # bcat, w1row, b1
             + 256 * 1024)                       # semaphores / misc headroom
    # Per batch-row VMEM cost: up to 3 x buffers + 2 output buffers (f32, 2 lanes).
    per_row = 3 * H1 * x_elem_bytes + 2 * 2 * 4
    tile_b = max(8, ((budget - fixed) // per_row // 8) * 8)
    tile_b = min(tile_b, 32768, _round_up(B, 8))
    # Keep >= 2 grid steps when B allows it so the "parallel" batch axis can shard
    # across both v7x TensorCores (no effect on single-TC v5e/v6e).
    if B >= 16:
        tile_b = min(tile_b, _round_up(pl.cdiv(B, 2), 8))
    return tile_b


def surv_model_forward(x, params):
    """x: (B, H1), float32 or bfloat16 (streamed as given). Returns (y, a) f32 (B, 1)."""
    if x.dtype not in (jnp.float32, jnp.bfloat16):
        x = x.astype(jnp.float32)        # matches the module's x.float()
    B, H1 = x.shape
    H2 = params["w0"].shape[1]

    # ---- Host-side folding (eval-mode BN into fc0) ----
    scale = params["bn_gamma"] * jax.lax.rsqrt(params["bn_var"] + BN_EPS)    # (1, H2)
    w0f = params["w0"] * scale                                               # (H1, H2)
    b0f = (params["b0"] - params["bn_mean"]) * scale + params["bn_beta"]     # (1, H2)

    # ---- Fuse fc2 into the fc0 matmul; weights match x's streaming dtype ----
    wcat = jnp.concatenate([w0f, params["w2"]], axis=1).astype(x.dtype)      # (H1, H2+1)
    bcat = jnp.concatenate([b0f, params["b2"]], axis=1).astype(jnp.float32)  # (1,  H2+1)
    w1row = params["w1"].T.astype(jnp.float32)                               # (1,  H2)
    b1 = params["b1"].astype(jnp.float32)                                    # (1,  1)

    # ---- VMEM-aware batch tiling (no host-side padding of x) ----
    budget = _vmem_budget_bytes()
    x_elem = jnp.dtype(x.dtype).itemsize
    tile_b = _choose_tile_b(B, H1, H2, x_elem, budget)
    n_tiles = pl.cdiv(B, tile_b)
    x_tile_bytes = tile_b * H1 * x_elem
    # Deeper x pipeline only when tiles are small AND there are enough grid steps.
    x_buffers = 3 if (x_tile_bytes < 4 * _MiB and n_tiles > 3) else 2

    out_shape = jax.ShapeDtypeStruct((B, 2), jnp.float32)
    out_spec = pl.BlockSpec((tile_b, 2), lambda i: (i, 0))
    cparams = pltpu.CompilerParams(
        dimension_semantics=("parallel",),
        vmem_limit_bytes=int(budget),
    )

    def run(use_buffer_hints):
        if use_buffer_hints:
            x_spec = pl.BlockSpec((tile_b, H1), lambda i: (i, 0),
                                  pipeline_mode=pl.Buffered(x_buffers))

            def resident(shape):
                return pl.BlockSpec(shape, lambda i: (0, 0),
                                    pipeline_mode=pl.Buffered(1))
        else:
            x_spec = pl.BlockSpec((tile_b, H1), lambda i: (i, 0))

            def resident(shape):
                return pl.BlockSpec(shape, lambda i: (0, 0))

        in_specs = [
            x_spec,                       # streamed x tiles
            resident((H1, H2 + 1)),       # fused (BN-folded fc0 | fc2) weights
            resident((1, H2 + 1)),        # fused bias
            resident((1, H2)),            # fc1 weight row
            resident((1, 1)),             # fc1 bias
        ]
        return pl.pallas_call(
            surv_kernel,
            out_shape=out_shape,
            grid=(n_tiles,),
            in_specs=in_specs,
            out_specs=out_spec,
            compiler_params=cparams,
        )(x, wcat, bcat, w1row, b1)

    try:
        out = run(True)
    except Exception:
        # pipeline_mode/Buffered hints unsupported on this jax/backend version:
        # fall back to default double-buffering (identical semantics).
        out = run(False)

    return out[:, 0:1], out[:, 1:2]


def init_params(key, hidden_dim1, hidden_dim2):
    """Deterministic synthetic parameters. Linear weights stored transposed as
    (in_features, out_features); biases and BN vectors as (1, features)."""
    ks = jax.random.split(key, 6)
    return {
        # fc0: Linear(H1, H2)
        "w0": jax.random.normal(ks[0], (hidden_dim1, hidden_dim2), jnp.float32) * 0.1,
        "b0": jax.random.normal(ks[1], (1, hidden_dim2), jnp.float32) * 0.1,
        # fc1: Linear(H2, 1)
        "w1": jax.random.normal(ks[2], (hidden_dim2, 1), jnp.float32) * 0.1,
        "b1": jax.random.normal(ks[3], (1, 1), jnp.float32) * 0.1,
        # fc2: Linear(H1, 1)
        "w2": jax.random.normal(ks[4], (hidden_dim1, 1), jnp.float32) * 0.1,
        "b2": jax.random.normal(ks[5], (1, 1), jnp.float32) * 0.1,
        # BatchNorm1d(H2) defaults: gamma=1, beta=0, running_mean=0, running_var=1
        "bn_gamma": jnp.ones((1, hidden_dim2), jnp.float32),
        "bn_beta": jnp.zeros((1, hidden_dim2), jnp.float32),
        "bn_mean": jnp.zeros((1, hidden_dim2), jnp.float32),
        "bn_var": jnp.ones((1, hidden_dim2), jnp.float32),
    }


def reference_forward(x, p):
    """Pure-JAX reference of the same (eval-mode) semantics, unfused, in f32."""
    xf = x.astype(jnp.float32)
    a = xf @ p["w2"] + p["b2"]
    h = xf @ p["w0"] + p["b0"]
    h = (h - p["bn_mean"]) * jax.lax.rsqrt(p["bn_var"] + BN_EPS) * p["bn_gamma"] + p["bn_beta"]
    h = jnp.maximum(h, 0.0)
    y = h @ p["w1"] + p["b1"]
    return y, a


if __name__ == "__main__":
    H1, H2 = 32, 16
    key = jax.random.PRNGKey(0)
    kx, kp, kr = jax.random.split(key, 3)
    params = init_params(kp, H1, H2)

    # ---- f32 path, tile-aligned batch ----
    x = jax.random.normal(kx, (8, H1), jnp.float32)
    y, a = surv_model_forward(x, params)
    jax.block_until_ready((y, a))
    y_ref, a_ref = reference_forward(x, params)
    assert y.shape == (8, 1) and a.shape == (8, 1)
    assert jnp.allclose(y, y_ref, atol=2e-5, rtol=1e-4)
    assert jnp.allclose(a, a_ref, atol=2e-5, rtol=1e-4)

    # ---- ragged final block (B not a multiple of the tile): masked write-back ----
    xr = jax.random.normal(kr, (13, H1), jnp.float32)
    yr, ar = surv_model_forward(xr, params)
    jax.block_until_ready((yr, ar))
    yr_ref, ar_ref = reference_forward(xr, params)
    assert yr.shape == (13, 1) and ar.shape == (13, 1)
    assert jnp.allclose(yr, yr_ref, atol=2e-5, rtol=1e-4)
    assert jnp.allclose(ar, ar_ref, atol=2e-5, rtol=1e-4)

    # ---- bf16-streamed path (cast done at the producer, not inside the wrapper) ----
    yb, ab = surv_model_forward(x.astype(jnp.bfloat16), params)
    jax.block_until_ready((yb, ab))
    assert jnp.allclose(yb, y_ref, atol=5e-2, rtol=5e-2)
    assert jnp.allclose(ab, a_ref, atol=5e-2, rtol=5e-2)

    print("KERNEL_OK")
</pallas_src>

<mosaic_0001>
module attributes {stable_mosaic.version = 11 : i64} {
  func.func @surv_kernel(%arg0: i32, %arg1: memref<8x32xf32, #tpu.memory_space<vmem>>, %arg2: memref<32x17xf32, #tpu.memory_space<vmem>>, %arg3: memref<1x17xf32, #tpu.memory_space<vmem>>, %arg4: memref<1x16xf32, #tpu.memory_space<vmem>>, %arg5: memref<1x1xf32, #tpu.memory_space<vmem>>, %arg6: memref<8x2xf32, #tpu.memory_space<vmem>>) attributes {dimension_semantics = [#tpu.dimension_semantics<parallel>], iteration_bounds = array<i64: 1>, scalar_prefetch = 0 : i64, scratch_operands = 0 : i64, tpu.core_type = #tpu.core_type<tc>, window_params = [{pipeline_mode = #tpu.pipeline_mode<double_buffered>, transform_indices = @transform_0, window_bounds = array<i64: 8, 32>}, {pipeline_mode = #tpu.pipeline_mode<synchronous>, transform_indices = @transform_1, window_bounds = array<i64: 32, 17>}, {pipeline_mode = #tpu.pipeline_mode<synchronous>, transform_indices = @transform_2, window_bounds = array<i64: 1, 17>}, {pipeline_mode = #tpu.pipeline_mode<synchronous>, transform_indices = @transform_3, window_bounds = array<i64: 1, 16>}, {pipeline_mode = #tpu.pipeline_mode<synchronous>, transform_indices = @transform_4, window_bounds = array<i64: 1, 1>}, {transform_indices = @transform_5, window_bounds = array<i64: 8, 2>}]} {
    %c0 = arith.constant 0 : index
    %c0_0 = arith.constant 0 : index
    %0 = vector.load %arg1[%c0, %c0_0] : memref<8x32xf32, #tpu.memory_space<vmem>>, vector<8x32xf32>
    %c0_1 = arith.constant 0 : index
    %c0_2 = arith.constant 0 : index
    %1 = vector.load %arg2[%c0_1, %c0_2] : memref<32x17xf32, #tpu.memory_space<vmem>>, vector<32x17xf32>
    %cst = arith.constant dense<0.000000e+00> : vector<8x17xf32>
    %2 = tpu.matmul %0, %1, %cst {dimension_numbers = #tpu.dot_dimension_numbers<[1], [0], [0], [1], [0, 0, 1, 1], [], []>} : vector<8x32xf32>, vector<32x17xf32>, vector<8x17xf32> -> vector<8x17xf32>
    %c0_3 = arith.constant 0 : index
    %c0_4 = arith.constant 0 : index
    %3 = vector.load %arg3[%c0_3, %c0_4] : memref<1x17xf32, #tpu.memory_space<vmem>>, vector<1x17xf32>
    %4 = vector.broadcast %3 : vector<1x17xf32> to vector<8x17xf32>
    %5 = arith.addf %2, %4 : vector<8x17xf32>
    %6 = vector.extract_strided_slice %5 {offsets = [0, 16], sizes = [8, 1], strides = [1, 1]} : vector<8x17xf32> to vector<8x1xf32>
    %7 = vector.extract_strided_slice %5 {offsets = [0, 0], sizes = [8, 16], strides = [1, 1]} : vector<8x17xf32> to vector<8x16xf32>
    %cst_5 = arith.constant 0.000000e+00 : f32
    %8 = vector.broadcast %cst_5 : f32 to vector<8x16xf32>
    %9 = arith.maximumf %7, %8 : vector<8x16xf32>
    %c0_6 = arith.constant 0 : index
    %c0_7 = arith.constant 0 : index
    %10 = vector.load %arg4[%c0_6, %c0_7] : memref<1x16xf32, #tpu.memory_space<vmem>>, vector<1x16xf32>
    %11 = vector.broadcast %10 : vector<1x16xf32> to vector<8x16xf32>
    %12 = arith.mulf %9, %11 : vector<8x16xf32>
    %cst_8 = arith.constant dense<0.000000e+00> : vector<8xf32>
    %13 = vector.multi_reduction <add>, %12, %cst_8 [1] : vector<8x16xf32> to vector<8xf32>
    %14 = vector.shape_cast %13 : vector<8xf32> to vector<8x1xf32>
    %c0_9 = arith.constant 0 : index
    %c0_10 = arith.constant 0 : index
    %15 = vector.load %arg5[%c0_9, %c0_10] : memref<1x1xf32, #tpu.memory_space<vmem>>, vector<1x1xf32>
    %16 = vector.broadcast %15 : vector<1x1xf32> to vector<8x1xf32>
    %17 = arith.addf %14, %16 : vector<8x1xf32>
    %c0_11 = arith.constant 0 : index
    %c0_12 = arith.constant 0 : index
    %18 = vector.load %arg6[%c0_11, %c0_12] : memref<8x2xf32, #tpu.memory_space<vmem>>, vector<8x1xf32>
    tpu.vector_store %arg6[%c0_11, %c0_12], %17 {strides = array<i32>} : memref<8x2xf32, #tpu.memory_space<vmem>>, vector<8x1xf32>,
    %c0_13 = arith.constant 0 : index
    %c1 = arith.constant 1 : index
    %19 = vector.load %arg6[%c0_13, %c1] : memref<8x2xf32, #tpu.memory_space<vmem>>, vector<8x1xf32>
    tpu.vector_store %arg6[%c0_13, %c1], %6 {strides = array<i32>} : memref<8x2xf32, #tpu.memory_space<vmem>>, vector<8x1xf32>,
    return
  }
  func.func @transform_0(%arg0: i32) -> (i32, i32) {
    %c0_i32 = arith.constant 0 : i32
    %c0_i32_0 = arith.constant 0 : i32
    return %arg0, %c0_i32 : i32, i32
  }
  func.func @transform_1(%arg0: i32) -> (i32, i32) {
    %c0_i32 = arith.constant 0 : i32
    %c0_i32_0 = arith.constant 0 : i32
    %c0_i32_1 = arith.constant 0 : i32
    return %c0_i32, %c0_i32_0 : i32, i32
  }
  func.func @transform_2(%arg0: i32) -> (i32, i32) {
    %c0_i32 = arith.constant 0 : i32
    %c0_i32_0 = arith.constant 0 : i32
    %c0_i32_1 = arith.constant 0 : i32
    return %c0_i32, %c0_i32_0 : i32, i32
  }
  func.func @transform_3(%arg0: i32) -> (i32, i32) {
    %c0_i32 = arith.constant 0 : i32
    %c0_i32_0 = arith.constant 0 : i32
    %c0_i32_1 = arith.constant 0 : i32
    return %c0_i32, %c0_i32_0 : i32, i32
  }
  func.func @transform_4(%arg0: i32) -> (i32, i32) {
    %c0_i32 = arith.constant 0 : i32
    %c0_i32_0 = arith.constant 0 : i32
    %c0_i32_1 = arith.constant 0 : i32
    return %c0_i32, %c0_i32_0 : i32, i32
  }
  func.func @transform_5(%arg0: i32) -> (i32, i32) {
    %c0_i32 = arith.constant 0 : i32
    %c0_i32_0 = arith.constant 0 : i32
    return %arg0, %c0_i32 : i32, i32
  }
}

module attributes {stable_mosaic.version = 11 : i64} {
  func.func @surv_kernel(%arg0: i32, %arg1: memref<8x32xf32, #tpu.memory_space<vmem>>, %arg2: memref<32x17xf32, #tpu.memory_space<vmem>>, %arg3: memref<1x17xf32, #tpu.memory_space<vmem>>, %arg4: memref<1x16xf32, #tpu.memory_space<vmem>>, %arg5: memref<1x1xf32, #tpu.memory_space<vmem>>, %arg6: memref<8x2xf32, #tpu.memory_space<vmem>>) attributes {dimension_semantics = [#tpu.dimension_semantics<parallel>], iteration_bounds = array<i64: 1>, scalar_prefetch = 0 : i64, scratch_operands = 0 : i64, tpu.core_type = #tpu.core_type<tc>, window_params = [{transform_indices = @transform_0, window_bounds = array<i64: 8, 32>}, {pipeline_mode = #tpu.pipeline_mode<synchronous>, transform_indices = @transform_1, window_bounds = array<i64: 32, 17>}, {pipeline_mode = #tpu.pipeline_mode<synchronous>, transform_indices = @transform_2, window_bounds = array<i64: 1, 17>}, {pipeline_mode = #tpu.pipeline_mode<synchronous>, transform_indices = @transform_3, window_bounds = array<i64: 1, 16>}, {pipeline_mode = #tpu.pipeline_mode<synchronous>, transform_indices = @transform_4, window_bounds = array<i64: 1, 1>}, {transform_indices = @transform_5, window_bounds = array<i64: 8, 2>}]} {
    %c0 = arith.constant 0 : index
    %c0_0 = arith.constant 0 : index
    %0 = vector.load %arg1[%c0, %c0_0] : memref<8x32xf32, #tpu.memory_space<vmem>>, vector<8x32xf32>
    %c0_1 = arith.constant 0 : index
    %c0_2 = arith.constant 0 : index
    %1 = vector.load %arg2[%c0_1, %c0_2] : memref<32x17xf32, #tpu.memory_space<vmem>>, vector<32x17xf32>
    %cst = arith.constant dense<0.000000e+00> : vector<8x17xf32>
    %2 = tpu.matmul %0, %1, %cst {dimension_numbers = #tpu.dot_dimension_numbers<[1], [0], [0], [1], [0, 0, 1, 1], [], []>} : vector<8x32xf32>, vector<32x17xf32>, vector<8x17xf32> -> vector<8x17xf32>
    %c0_3 = arith.constant 0 : index
    %c0_4 = arith.constant 0 : index
    %3 = vector.load %arg3[%c0_3, %c0_4] : memref<1x17xf32, #tpu.memory_space<vmem>>, vector<1x17xf32>
    %4 = vector.broadcast %3 : vector<1x17xf32> to vector<8x17xf32>
    %5 = arith.addf %2, %4 : vector<8x17xf32>
    %6 = vector.extract_strided_slice %5 {offsets = [0, 16], sizes = [8, 1], strides = [1, 1]} : vector<8x17xf32> to vector<8x1xf32>
    %7 = vector.extract_strided_slice %5 {offsets = [0, 0], sizes = [8, 16], strides = [1, 1]} : vector<8x17xf32> to vector<8x16xf32>
    %cst_5 = arith.constant 0.000000e+00 : f32
    %8 = vector.broadcast %cst_5 : f32 to vector<8x16xf32>
    %9 = arith.maximumf %7, %8 : vector<8x16xf32>
    %c0_6 = arith.constant 0 : index
    %c0_7 = arith.constant 0 : index
    %10 = vector.load %arg4[%c0_6, %c0_7] : memref<1x16xf32, #tpu.memory_space<vmem>>, vector<1x16xf32>
    %11 = vector.broadcast %10 : vector<1x16xf32> to vector<8x16xf32>
    %12 = arith.mulf %9, %11 : vector<8x16xf32>
    %cst_8 = arith.constant dense<0.000000e+00> : vector<8xf32>
    %13 = vector.multi_reduction <add>, %12, %cst_8 [1] : vector<8x16xf32> to vector<8xf32>
    %14 = vector.shape_cast %13 : vector<8xf32> to vector<8x1xf32>
    %c0_9 = arith.constant 0 : index
    %c0_10 = arith.constant 0 : index
    %15 = vector.load %arg5[%c0_9, %c0_10] : memref<1x1xf32, #tpu.memory_space<vmem>>, vector<1x1xf32>
    %16 = vector.broadcast %15 : vector<1x1xf32> to vector<8x1xf32>
    %17 = arith.addf %14, %16 : vector<8x1xf32>
    %c0_11 = arith.constant 0 : index
    %c0_12 = arith.constant 0 : index
    %18 = vector.load %arg6[%c0_11, %c0_12] : memref<8x2xf32, #tpu.memory_space<vmem>>, vector<8x1xf32>
    tpu.vector_store %arg6[%c0_11, %c0_12], %17 {strides = array<i32>} : memref<8x2xf32, #tpu.memory_space<vmem>>, vector<8x1xf32>,
    %c0_13 = arith.constant 0 : index
    %c1 = arith.constant 1 : index
    %19 = vector.load %arg6[%c0_13, %c1] : memref<8x2xf32, #tpu.memory_space<vmem>>, vector<8x1xf32>
    tpu.vector_store %arg6[%c0_13, %c1], %6 {strides = array<i32>} : memref<8x2xf32, #tpu.memory_space<vmem>>, vector<8x1xf32>,
    return
  }
  func.func @transform_0(%arg0: i32) -> (i32, i32) {
    %c0_i32 = arith.constant 0 : i32
    %c0_i32_0 = arith.constant 0 : i32
    return %arg0, %c0_i32 : i32, i32
  }
  func.func @transform_1(%arg0: i32) -> (i32, i32) {
    %c0_i32 = arith.constant 0 : i32
    %c0_i32_0 = arith.constant 0 : i32
    %c0_i32_1 = arith.constant 0 : i32
    return %c0_i32, %c0_i32_0 : i32, i32
  }
  func.func @transform_2(%arg0: i32) -> (i32, i32) {
    %c0_i32 = arith.constant 0 : i32
    %c0_i32_0 = arith.constant 0 : i32
    %c0_i32_1 = arith.constant 0 : i32
    return %c0_i32, %c0_i32_0 : i32, i32
  }
  func.func @transform_3(%arg0: i32) -> (i32, i32) {
    %c0_i32 = arith.constant 0 : i32
    %c0_i32_0 = arith.constant 0 : i32
    %c0_i32_1 = arith.constant 0 : i32
    return %c0_i32, %c0_i32_0 : i32, i32
  }
  func.func @transform_4(%arg0: i32) -> (i32, i32) {
    %c0_i32 = arith.constant 0 : i32
    %c0_i32_0 = arith.constant 0 : i32
    %c0_i32_1 = arith.constant 0 : i32
    return %c0_i32, %c0_i32_0 : i32, i32
  }
  func.func @transform_5(%arg0: i32) -> (i32, i32) {
    %c0_i32 = arith.constant 0 : i32
    %c0_i32_0 = arith.constant 0 : i32
    return %arg0, %c0_i32 : i32, i32
  }
}

</mosaic_0001>

<bundles_post_ra>
// kernel: tpu_custom_call.1
= control target key start
LH: loop header
LB: loop body
LE: loop exit
PB: predicated region body
PF: predicated region fallthrough
CT: control target
= control target key end

     0   :  { %v171_v0 = vmov 0.0|0.0   ;;  %vm172_vm0 = vmmov 0   ;;  %v173_v4 = vmov 0.0   ;;  %vm34_vm1 = vcmask 261120   ;;  %s235_s1 = inlined_call_operand.vmem [shape: f32[32,17], index: 1, kind: input, shape index: {}]   ;;  %s236_s0 = inlined_call_operand.vmem [shape: f32[8,32], index: 0, kind: input, shape index: {}]   ;;  %s237_s4 = inlined_call_operand.<no memory space> [shape: f32[1,1], index: 4, kind: input, shape index: {}]   ;;  %s238_s2 = inlined_call_operand.vmem [shape: f32[1,17], index: 2, kind: input, shape index: {}]   ;;  %s239_s3 = inlined_call_operand.vmem [shape: f32[1,16], index: 3, kind: input, shape index: {}]   ;;  %s240_s5 = inlined_call_operand.vmem [shape: f32[8,2], index: 5, kind: output, shape index: {}]  }
   0x1   :  { %161 = vmatprep.subr.bf16.mxu0 %v171_v0  ;;  %v23_v1 = vld [vmem:[%s235_s1] sm:$0xff]  ;;  %v24_v2 = vld [vmem:[%s235_s1 + $0x8] sm:$0xff]  ;;  %v25_v3 = vld [vmem:[%s235_s1 + $0x10] sm:$0xff]  ;;  %158 = vmatprep.mubr.msk.f32.mxu0 %vm172_vm0, %v173_v4  ;;  %v10_v9 = vstv %s237_s4  ;;  %vm117_vm2 = vcmask 130048   ;;  %vm129_vm3 = vcmask 7168   ;;  %vm135_vm4 = vcmask 15368  }
   0x2   :  { %v162_v5 = vpack.c.bf16 %v24_v2, %v23_v1  ;;  %v26_v6 = vld [vmem:[%s235_s1 + $0x18] sm:$0xff]  ;;  %v22_v8 = vld [vmem:[%s236_s0] sm:$0xff]  ;;  %11 = vst [vmem:[#allocation2] sm:$0x1] %v10_v9  ;;  %s174_s0 = smov 113  }
   0x3   :  { %v165_v7 = vpack.c.bf16 %v26_v6, %v25_v3  ;;  %v141_v10 = vld [vmem:[%s238_s2] ss:$0 sm:$0xff] }
   0x4   :  { %163 = vmatpush3.bf16.msra.mxu0 %v162_v5  ;;  %v143_v14 = vld [vmem:[%s239_s3] ss:$0 sm:$0xff] }
   0x5   :  { %164 = vmatprep.subr.bf16.mxu0 %v171_v0 }
   0x8   :  { %166 = vmatpush3.bf16.msra.mxu0 %v165_v7 }
   0x9   :  { %v144_v18 = vld [vmem:[#allocation2] ss:$0 sm:$0xff] }
   0xb   :  { %159 = vmatmul.mubr.msk.f32.vlgmr.msra.gmra.mrb[0].mxu0 %vm34_vm1, %v22_v8 }
  0xde   :  { %v104_v11 = vpop.f32.mrb[0].mxu0 }
  0xdf   :  { %v105_v12 = vadd.f32 %v141_v10, %v104_v11  ;;  %v160_v13 = vpop.f32.mrb[1].mxu0 }
  0xe1   :  { %v108_v15 = vmax.f32 %v105_v12, 0.0 }
  0xe3   :  { %v116_v16 = vmul.f32 %v143_v14, %v108_v15 }
  0xe5   :  { %v118_v17 = vsel %vm117_vm2, %v116_v16, 0.0 }
  0xe6   :  { %119 = vadd.xlane.f32.xlu0 %v118_v17 }
  0xfc   :  { %132 = vrot.lane.b32.xlu0 %v105_v12, %s174_s0 }
 0x173   :  { %v120_v19 = vpop.xlane.xlu0 %119 }
 0x174   :  { %v128_v20 = vadd.f32 %v144_v18, %v120_v19 }
 0x176   :  { %130 = vst.msk [vmem:[%s240_s5] sm:$0xff] %vm129_vm3, %v128_v20 }
 0x177   :  { %v133_v21 = vpop.permute.xlu0 %132 }
 0x178   :  { %136 = vst.msk [vmem:[%s240_s5] sm:$0xff] %vm135_vm4, %v133_v21 }

// kernel: tpu_custom_call.1
= control target key start
LH: loop header
LB: loop body
LE: loop exit
PB: predicated region body
PF: predicated region fallthrough
CT: control target
= control target key end

     0   :  { %v171_v0 = vmov 0.0|0.0   ;;  %vm172_vm0 = vmmov 0   ;;  %v173_v4 = vmov 0.0   ;;  %vm34_vm1 = vcmask 261120   ;;  %s235_s1 = inlined_call_operand.vmem [shape: f32[32,17], index: 1, kind: input, shape index: {}]   ;;  %s236_s0 = inlined_call_operand.vmem [shape: f32[8,32], index: 0, kind: input, shape index: {}]   ;;  %s237_s4 = inlined_call_operand.<no memory space> [shape: f32[1,1], index: 4, kind: input, shape index: {}]   ;;  %s238_s2 = inlined_call_operand.vmem [shape: f32[1,17], index: 2, kind: input, shape index: {}]   ;;  %s239_s3 = inlined_call_operand.vmem [shape: f32[1,16], index: 3, kind: input, shape index: {}]   ;;  %s240_s5 = inlined_call_operand.vmem [shape: f32[8,2], index: 5, kind: output, shape index: {}]  }
   0x1   :  { %161 = vmatprep.subr.bf16.mxu0 %v171_v0  ;;  %v23_v1 = vld [vmem:[%s235_s1] sm:$0xff]  ;;  %v24_v2 = vld [vmem:[%s235_s1 + $0x8] sm:$0xff]  ;;  %v25_v3 = vld [vmem:[%s235_s1 + $0x10] sm:$0xff]  ;;  %158 = vmatprep.mubr.msk.f32.mxu0 %vm172_vm0, %v173_v4  ;;  %v10_v9 = vstv %s237_s4  ;;  %vm117_vm2 = vcmask 130048   ;;  %vm129_vm3 = vcmask 7168   ;;  %vm135_vm4 = vcmask 15368  }
   0x2   :  { %v162_v5 = vpack.c.bf16 %v24_v2, %v23_v1  ;;  %v26_v6 = vld [vmem:[%s235_s1 + $0x18] sm:$0xff]  ;;  %v22_v8 = vld [vmem:[%s236_s0] sm:$0xff]  ;;  %11 = vst [vmem:[#allocation2] sm:$0x1] %v10_v9  ;;  %s174_s0 = smov 113  }
   0x3   :  { %v165_v7 = vpack.c.bf16 %v26_v6, %v25_v3  ;;  %v141_v10 = vld [vmem:[%s238_s2] ss:$0 sm:$0xff] }
   0x4   :  { %163 = vmatpush3.bf16.msra.mxu0 %v162_v5  ;;  %v143_v14 = vld [vmem:[%s239_s3] ss:$0 sm:$0xff] }
   0x5   :  { %164 = vmatprep.subr.bf16.mxu0 %v171_v0 }
   0x8   :  { %166 = vmatpush3.bf16.msra.mxu0 %v165_v7 }
   0x9   :  { %v144_v18 = vld [vmem:[#allocation2] ss:$0 sm:$0xff] }
   0xb   :  { %159 = vmatmul.mubr.msk.f32.vlgmr.msra.gmra.mrb[0].mxu0 %vm34_vm1, %v22_v8 }
  0xde   :  { %v104_v11 = vpop.f32.mrb[0].mxu0 }
  0xdf   :  { %v105_v12 = vadd.f32 %v141_v10, %v104_v11  ;;  %v160_v13 = vpop.f32.mrb[1].mxu0 }
  0xe1   :  { %v108_v15 = vmax.f32 %v105_v12, 0.0 }
  0xe3   :  { %v116_v16 = vmul.f32 %v143_v14, %v108_v15 }
  0xe5   :  { %v118_v17 = vsel %vm117_vm2, %v116_v16, 0.0 }
  0xe6   :  { %119 = vadd.xlane.f32.xlu0 %v118_v17 }
  0xfc   :  { %132 = vrot.lane.b32.xlu0 %v105_v12, %s174_s0 }
 0x173   :  { %v120_v19 = vpop.xlane.xlu0 %119 }
 0x174   :  { %v128_v20 = vadd.f32 %v144_v18, %v120_v19 }
 0x176   :  { %130 = vst.msk [vmem:[%s240_s5] sm:$0xff] %vm129_vm3, %v128_v20 }
 0x177   :  { %v133_v21 = vpop.permute.xlu0 %132 }
 0x178   :  { %136 = vst.msk [vmem:[%s240_s5] sm:$0xff] %vm135_vm4, %v133_v21 }

</bundles_post_ra>
